<compile_context>
chip_gen: v7x
topology: tpu7x:2x2x1
jax: 0.10.0
libtpu: 0.0.40
codegen_flags: <defaults>
</compile_context>

<pallas_src>
import jax
import jax.numpy as jnp
from jax.experimental import pallas as pl
from jax.experimental.pallas import tpu as pltpu


def out_kernel(x_ref, w_ref, b_ref, o_ref):
    # x_ref: (Cin, THW)  w_ref: (Cout, Cin)  b_ref: (Cout, 1)  o_ref: (Cout, THW)
    x = x_ref[...].astype(jnp.bfloat16)
    w = w_ref[...].astype(jnp.bfloat16)
    acc = jnp.dot(w, x, preferred_element_type=jnp.float32)   # (Cout, THW) f32
    o_ref[...] = acc + b_ref[...]                             # lane-dense store


def out_conv1x1(x_nchw, weight_oihw, bias):
    """1x1 Conv2d with bias (forward pass of the PyTorch `Out` module).

    x_nchw:      [N, Cin, H, W]    float32
    weight_oihw: [Cout, Cin, 1, 1] (PyTorch OIHW layout)
    bias:        [Cout]
    returns      [N, Cout, H, W]   float32
    """
    N, Cin, H, W = x_nchw.shape
    Cout = weight_oihw.shape[0]
    HW = H * W

    # Free reshapes (data stays contiguous): spatial axis -> lane axis.
    x3 = x_nchw.reshape(N, Cin, HW).astype(jnp.float32)
    w2 = weight_oihw.reshape(Cout, Cin).astype(jnp.float32)
    b2 = bias.reshape(Cout, 1).astype(jnp.float32)

    # Lane-axis tile: one tile at this toy size; 1024/2048-wide tiles when large
    # so the per-step working set stays well inside VMEM on v7x/v5e.
    if HW % 2048 == 0:
        thw = 2048
    elif HW % 1024 == 0:
        thw = 1024
    else:
        thw = HW
    grid = (N, HW // thw)

    out3 = pl.pallas_call(
        out_kernel,
        out_shape=jax.ShapeDtypeStruct((N, Cout, HW), jnp.float32),
        grid=grid,
        in_specs=[
            # batch dim squeezed out; (Cin, THW) tile per step
            pl.BlockSpec((None, Cin, thw), lambda n, s: (n, 0, s)),
            # small weight / bias tiles, resident every step
            pl.BlockSpec((Cout, Cin), lambda n, s: (0, 0)),
            pl.BlockSpec((Cout, 1), lambda n, s: (0, 0)),
        ],
        out_specs=pl.BlockSpec((None, Cout, thw), lambda n, s: (n, 0, s)),
        compiler_params=pltpu.CompilerParams(
            dimension_semantics=("parallel", "parallel")),
    )(x3, w2, b2)

    return out3.reshape(N, Cout, H, W)


def reference(x_nchw, weight_oihw, bias):
    """Pure-JAX reference mirroring nn.Conv2d(kernel_size=1) with bias."""
    y = jax.lax.conv_general_dilated(
        x_nchw, weight_oihw, (1, 1), 'VALID',
        dimension_numbers=('NCHW', 'OIHW', 'NCHW'),
        precision=jax.lax.Precision.HIGHEST)
    return y + bias.reshape(1, -1, 1, 1)


if __name__ == "__main__":
    key = jax.random.PRNGKey(0)
    k_x, k_w, k_b = jax.random.split(key, 3)

    # Out(in_channels=4, out_channels=8) on a [2, 4, 16, 16] input.
    N, Cin, H, W = 2, 4, 16, 16
    Cout = 8

    x = jax.random.normal(k_x, (N, Cin, H, W), jnp.float32)
    w = jax.random.normal(k_w, (Cout, Cin, 1, 1), jnp.float32) * 0.1
    b = 0.1 * jax.random.normal(k_b, (Cout,), jnp.float32)

    out = jax.block_until_ready(out_conv1x1(x, w, b))
    ref = jax.block_until_ready(reference(x, w, b))

    assert out.shape == (N, Cout, H, W)
    assert jnp.allclose(out, ref, atol=1e-2, rtol=1e-2), "mismatch vs reference"

    print("KERNEL_OK")
</pallas_src>

<mosaic_0001>
module attributes {stable_mosaic.version = 11 : i64} {
  func.func @out_kernel(%arg0: i32, %arg1: i32, %arg2: memref<1x4x256xf32, #tpu.memory_space<vmem>>, %arg3: memref<8x4xf32, #tpu.memory_space<vmem>>, %arg4: memref<8x1xf32, #tpu.memory_space<vmem>>, %arg5: memref<1x8x256xf32, #tpu.memory_space<vmem>>) attributes {dimension_semantics = [#tpu.dimension_semantics<parallel>, #tpu.dimension_semantics<parallel>], iteration_bounds = array<i64: 2, 1>, scalar_prefetch = 0 : i64, scratch_operands = 0 : i64, tpu.core_type = #tpu.core_type<tc>, window_params = [{transform_indices = @transform_0, window_bounds = array<i64: 1, 4, 256>}, {pipeline_mode = #tpu.pipeline_mode<synchronous>, transform_indices = @transform_1, window_bounds = array<i64: 8, 4>}, {pipeline_mode = #tpu.pipeline_mode<synchronous>, transform_indices = @transform_2, window_bounds = array<i64: 8, 1>}, {transform_indices = @transform_3, window_bounds = array<i64: 1, 8, 256>}]} {
    %c0 = arith.constant 0 : index
    %c0_0 = arith.constant 0 : index
    %c0_1 = arith.constant 0 : index
    %0 = vector.load %arg2[%c0, %c0_0, %c0_1] : memref<1x4x256xf32, #tpu.memory_space<vmem>>, vector<1x4x256xf32>
    %1 = vector.shape_cast %0 : vector<1x4x256xf32> to vector<4x256xf32>
    %2 = arith.truncf %1 : vector<4x256xf32> to vector<4x256xbf16>
    %c0_2 = arith.constant 0 : index
    %c0_3 = arith.constant 0 : index
    %3 = vector.load %arg3[%c0_2, %c0_3] : memref<8x4xf32, #tpu.memory_space<vmem>>, vector<8x4xf32>
    %4 = arith.truncf %3 : vector<8x4xf32> to vector<8x4xbf16>
    %cst = arith.constant dense<0.000000e+00> : vector<8x256xf32>
    %5 = tpu.matmul %4, %2, %cst {dimension_numbers = #tpu.dot_dimension_numbers<[1], [0], [0], [1], [0, 0, 1, 1], [], []>} : vector<8x4xbf16>, vector<4x256xbf16>, vector<8x256xf32> -> vector<8x256xf32>
    %c0_4 = arith.constant 0 : index
    %c0_5 = arith.constant 0 : index
    %6 = vector.load %arg4[%c0_4, %c0_5] : memref<8x1xf32, #tpu.memory_space<vmem>>, vector<8x1xf32>
    %7 = vector.broadcast %6 : vector<8x1xf32> to vector<8x256xf32>
    %8 = arith.addf %5, %7 : vector<8x256xf32>
    %c0_6 = arith.constant 0 : index
    %c0_7 = arith.constant 0 : index
    %c0_8 = arith.constant 0 : index
    %9 = vector.load %arg5[%c0_6, %c0_7, %c0_8] : memref<1x8x256xf32, #tpu.memory_space<vmem>>, vector<1x8x256xf32>
    %10 = vector.shape_cast %9 : vector<1x8x256xf32> to vector<8x256xf32>
    %11 = vector.shape_cast %8 : vector<8x256xf32> to vector<1x8x256xf32>
    tpu.vector_store %arg5[%c0_6, %c0_7, %c0_8], %11 {strides = array<i32>} : memref<1x8x256xf32, #tpu.memory_space<vmem>>, vector<1x8x256xf32>,
    return
  }
  func.func @transform_0(%arg0: i32, %arg1: i32) -> (i32, i32, i32) {
    %c0_i32 = arith.constant 0 : i32
    %c0_i32_0 = arith.constant 0 : i32
    return %arg0, %c0_i32, %arg1 : i32, i32, i32
  }
  func.func @transform_1(%arg0: i32, %arg1: i32) -> (i32, i32) {
    %c0_i32 = arith.constant 0 : i32
    %c0_i32_0 = arith.constant 0 : i32
    %c0_i32_1 = arith.constant 0 : i32
    return %c0_i32, %c0_i32_0 : i32, i32
  }
  func.func @transform_2(%arg0: i32, %arg1: i32) -> (i32, i32) {
    %c0_i32 = arith.constant 0 : i32
    %c0_i32_0 = arith.constant 0 : i32
    %c0_i32_1 = arith.constant 0 : i32
    return %c0_i32, %c0_i32_0 : i32, i32
  }
  func.func @transform_3(%arg0: i32, %arg1: i32) -> (i32, i32, i32) {
    %c0_i32 = arith.constant 0 : i32
    %c0_i32_0 = arith.constant 0 : i32
    return %arg0, %c0_i32, %arg1 : i32, i32, i32
  }
}

</mosaic_0001>

<bundles_post_ra>
// kernel: tpu_custom_call.1
= control target key start
LH: loop header
LB: loop body
LE: loop exit
PB: predicated region body
PF: predicated region fallthrough
CT: control target
= control target key end

     0   :  { %8 = vsyncpa [#allocation3], 0  ;;  %s657_s0 = inlined_call_operand.vmem [shape: f32[2,4,256], index: 0, kind: input, shape index: {}]   ;;  %s658_s1 = inlined_call_operand.vmem [shape: f32[8,4], index: 1, kind: input, shape index: {}]   ;;  %s659_s2 = inlined_call_operand.vmem [shape: f32[8,1], index: 2, kind: input, shape index: {}]   ;;  %s660_s3 = inlined_call_operand.hbm [shape: f32[2,8,256], index: 3, kind: output, shape index: {}]  }
   0x1   :  { %10 = vsyncpa [#allocation3 + $0x1], 0  ;;  %s539_s12 = smov 0   ;;  %s541_s13 = smov 0  }
   0x2   :  { %s543_s14 = smov 0   ;;  %s545_s15 = smov 0  }
   0x3   :  { %s547_s16 = smov 0   ;;  %s549_s17 = smov 0  }
   0x4 LB: > { %s362_s18 = sadd.s32 4294967295, %s515_s17   ;;  %s363_s19 = sadd.s32 4294967294, %s515_s17   ;;  %s515_s17 = sphi %s549_s17, %s16_s17   ;;  %s511_s16 = sphi %s547_s16, %s667_s16   ;;  %s507_s15 = sphi %s545_s15, %s666_s15   ;;  %s503_s14 = sphi %s543_s14, %s665_s14   ;;  %s499_s13 = sphi %s541_s13, %s664_s13   ;;  %s495_s12 = sphi %s539_s12, %s663_s12  }
   0x5   : > { %s28_s20 = sadd.s32 1, %s511_s16  ;;  %s107_s21 = sadd.s32 1, %s503_s14 }
   0x6   : > { %p30_p0 = scmp.ge.s32.totalorder %s28_s20, 2  ;;  %p117_p1 = scmp.ne.s32.totalorder %s503_s14, %s499_s13 }
   0x7   : > { %p118_p2 = scmp.eq.s32.totalorder %s362_s18, 1  ;;  %p123_p3 = scmp.ne.s32.totalorder %s499_s13, %s495_s12 }
   0x8   : > { %s669_s20 = smov (%p30_p0, %s28_s20), 0  ;;  %p124_p5 = scmp.eq.s32.totalorder %s363_s19, 1 }
   0x9   : > { %p579_p4 = por %p118_p2, %p117_p1  ;;  %s102_s23 = ssub.s32 %s511_s16, %s669_s20 }
   0xa   : > { %p366_p6 = scmp.ge.s32.totalorder %s515_s17, 1  ;;  %p105_p7 = scmp.eq.s32.totalorder %s102_s23, 0 }
   0xb   : > { %p586_p8 = por %p124_p5, %p123_p3  ;;  %p161_p9 = scmp.lt.s32.totalorder %s515_s17, 3 }
   0xc   : > { %s592_s25 = scalar_select %p105_p7, %s503_s14, %s107_s21  }
   0xd   : > { %p162_p10 = pnand %p366_p6, %p161_p9 }
   0xe   : > { %p190_p11 = scmp.lt.s32.totalorder (!%p162_p10), %s507_s15, 1  ;;  %v209_v0 = vld [vmem:[%s659_s2] sm:$0xff] (!%p162_p10)  ;;  %v517_v1 = vmov (!%p162_p10), 0   ;;  %vm219_vm0 = vcmask (!%p162_p10), 1041408   ;;  %vm215_vm1 = vcmask (!%p162_p10), 31744   ;;  %s186_s8 = sand.u32 (!%p162_p10), 1, %s499_s13  }
   0xf   : > { %165 = sbr.rel (%p162_p10) target bundleno = 264 (0x108), region = 32  ;;  %258 = vmatprep.mubr.bf16.mxu0 (!%p162_p10), %v517_v1  ;;  %435 = vset.pattern.permute.xlu0 (!%p162_p10), %v517_v1  ;;  %v207_v5 = vld [vmem:[%s658_s1] sm:$0xff] (!%p162_p10)  ;;  %s367_s9 = sshll.u32 (!%p162_p10), %s186_s8, 4 }
  0x10   : > { %212 = vperm.xlu0 (!%p162_p10), %435, %v209_v0   ;;  %v208_v8 = vpack.c.bf16 (!%p162_p10), %v207_v5, %v207_v5  ;;  %s378_s10 = sshll.u32 (!%p162_p10), %s507_s15, 8  ;;  %s188_s11 = scalar_lea.vmem (!%p162_p10), [#allocation2], %s367_s9 }
  0x11   : > { %s286_s18 = sshll.u32 (!%p162_p10), %s188_s11, 4  ;;  %s610_s23 = scalar_lea.hbm (!%p162_p10), %s660_s3, %s378_s10  ;;  %s612_s18 = int_to_ptr.vmem [resolvable:$true] %s286_s18 }
  0x12   : > { %s437_s26 = scalar_lea.vmem (!%p162_p10), %s612_s18, 256  ;;  %s518_s27 = smov (!%p162_p10), [#allocation2]  }
  0x13   : > { %p438_p12 = scmp.ne.s32.totalorder (!%p162_p10), %s612_s18, %s437_s26 }
  0x15   : > { %p439_p13 = pnand (!%p162_p10), %p438_p12, %p579_p4 }
  0x16   : > { %s191_s28 = scalar_select %p190_p11, %s507_s15, 1 }
  0x17   : > { %s270_s15 = scalar_lea.sflag [#allocation3], %s186_s8  ;;  %p440_p0 = pneg %p439_p13 }
  0x18   : > { %s377_s29 = sshll.u32 %s191_s28, 3  ;;  %s441_s28 = sshll.u32 %s518_s27, 4  ;;  %s442_s28 = int_to_ptr.vmem [resolvable:$false] %s441_s28 }
  0x19   : > { %s197_s5 = scalar_lea.vmem %s657_s0, %s377_s29  ;;  %s443_s29 = scalar_lea.vmem %s442_s28, 512 }
  0x1a   : > { %v201_v2 = vld [vmem:[%s197_s5] sm:$0xff]  ;;  %p444_p1 = scmp.lt.s32.totalorder %s612_s18, %s442_s28  ;;  %p445_p2 = scmp.lt.s32.totalorder %s443_s29, %s437_s26 }
  0x1b   : > { %v203_v3 = vcombine.high %v201_v2, %v201_v2  ;;  %v205_v4 = vpack.c.bf16 %v201_v2, %v201_v2 }
  0x1c   : > { %p446_p3 = por %p445_p2, %p444_p1 }
  0x1d   : > { %v206_v6 = vpack.c.bf16 %v203_v3, %v203_v3  ;;  %v221_v7 = vsel %vm219_vm0, %v205_v4, 0 }
  0x1e   : > { %p447_p5 = pnand %p446_p3, %p440_p0 }
  0x1f   : > { %370 = vmatprep.subr.msk.bf16.mxu0 %vm219_vm0, %v206_v6 }
  0x20   : > { %227 = vmatpush1.bf16.msra.mxu0 %v221_v7 }
  0x23   : > { %371 = vmatmul.mubr.msk.bf16.vlgmr.msra.gmra.mrb[0].mxu0 %vm215_vm1, %v208_v8 }
  0x8f   : > { %v213_v9 = vpop.permute.xlu0 %212 }
  0xf6   : > { %v260_v10 = vpop.f32.mrb[0].mxu0 }
  0xf7   : > { %v261_v11 = vadd.f32 %v260_v10, %v213_v9  ;;  %v262_v12 = vpop.f32.mrb[1].mxu0 }
  0xf8   : > { %v263_v13 = vadd.f32 %v262_v12, %v213_v9  ;;  %v264_v14 = vpop.f32.mrb[2].mxu0 }
  0xf9   : > { %267 = vst [vmem:[%s188_s11] sm:$0xff] %v261_v11  ;;  %v265_v15 = vpop.f32.mrb[3].mxu0 }
  0xfa   : > { %268 = vst [vmem:[%s188_s11 + $0x8] sm:$0xff] %v263_v13 }
  0xfb   : > { %450 = shalt.err (!%p447_p5)
}
  0xfc   : > { %s451_s30 = scalar_lea.hbm %s610_s23, 256  ;;  %s455_s6 = scalar_lea.hbm %s660_s3, 512 }
  0xfd   : > { %p452_p6 = scmp.ne.s32.totalorder %s610_s23, %s451_s30  ;;  %p456_p10 = scmp.lt.u32.totalorder %s610_s23, %s660_s3 }
  0xfe   : > { %p457_p11 = scmp.lt.u32.totalorder %s455_s6, %s451_s30  ;;  %p459_p13 = scmp.lt.u32.totalorder %s451_s30, %s610_s23 }
  0xff   : > { %p453_p7 = pnand %p452_p6, %p579_p4 }
 0x100   : > { %p458_p12 = por %p457_p11, %p456_p10 }
 0x101   : > { %p454_p9 = pneg %p453_p7 }
 0x102   : > { %p460_p0 = por %p459_p13, %p458_p12 }
 0x104   : > { %p461_p1 = pnand %p460_p0, %p454_p9 }
 0x106   : > { %464 = shalt.err (!%p461_p1)
}
 0x107   : > { %379 = dma.vmem_to_hbm [thread:$0]  (%p579_p4), %s612_s18, 256, %s610_s23, %s270_s15  }
 0x108 PF: > { %p385_p2 = scmp.ge.s32.totalorder %s515_s17, 2  ;;  %s298_s9 = sand.u32 1, %s495_s12  }
 0x109   : > { %s299_s10 = scalar_lea.sflag [#allocation3], %s298_s9 }
 0x10a   : > { %p382_p3 = pnand %p385_p2, %p586_p8 }
 0x10c   : > { %490 = dma.done.wait (!%p382_p3), %s299_s10, 256  }
 0x10d   : > { %492 = vsyncadd (!%p382_p3), %s299_s10, 4294967040  ;;  %s16_s17 = sadd.s32 1, %s515_s17   ;;  %s663_s12 = smov %s499_s13 }
 0x10e   : > { %p13_p5 = scmp.ge.s32.totalorder %s16_s17, 4   ;;  %s664_s13 = smov %s503_s14 }
 0x10f   : > { %s665_s14 = smov %s592_s25  ;;  %s666_s15 = smov %s511_s16 }
 0x110   : > { %s667_s16 = smov %s669_s20  ;;  %15 = sbr.rel (!%p13_p5) target bundleno = 4 (0x4), region = 67 }
 0x117   :  { %304 = vsyncpa [#allocation3], 1 }
 0x118   :  { %306 = vsyncpa [#allocation3 + $0x1], 1 }

</bundles_post_ra>
